<compile_context>
chip_gen: v5e
topology: v5e:2x2
jax: 0.10.0
libtpu: 0.0.40
codegen_flags: <defaults>
</compile_context>

<pallas_src>
import numpy as np
import jax
import jax.numpy as jnp
from jax import lax
from jax.experimental import pallas as pl
from jax.experimental.pallas import tpu as pltpu


def _round_up(n, m):
    return ((n + m - 1) // m) * m


# ----------------------------------------------------------------------------
# Glue: ConvTranspose2d (fixed input size) -> dense linear operator
# ----------------------------------------------------------------------------
def convtranspose2d_as_matrix(w, ih, iw, stride, padding):
    """w: (IC, OC, KH, KW) numpy array (PyTorch ConvTranspose2d weight layout).

    Returns M of shape (IC*IH*IW, OC*OH*OW) such that
      out_flat = in_flat @ M   reproduces ConvTranspose2d(in) (NCHW flattening),
    plus the output (OC, OH, OW) shape.
    """
    ic, oc, kh, kw = w.shape
    oh = (ih - 1) * stride - 2 * padding + kh
    ow = (iw - 1) * stride - 2 * padding + kw
    m = np.zeros((ic * ih * iw, oc * oh * ow), dtype=np.float32)
    for c_in in range(ic):
        for iy in range(ih):
            for ix in range(iw):
                row = c_in * ih * iw + iy * iw + ix
                for c_out in range(oc):
                    for ky in range(kh):
                        for kx in range(kw):
                            oy = iy * stride - padding + ky
                            ox = ix * stride - padding + kx
                            if 0 <= oy < oh and 0 <= ox < ow:
                                col = c_out * oh * ow + oy * ow + ox
                                m[row, col] += w[c_in, c_out, ky, kx]
    return m, (oc, oh, ow)


def _pad2d(a, rows, cols):
    a = np.asarray(a, dtype=np.float32)
    out = np.zeros((rows, cols), dtype=np.float32)
    out[: a.shape[0], : a.shape[1]] = a
    return out


# ----------------------------------------------------------------------------
# Pallas kernel: the whole decoder forward (per batch tile)
# ----------------------------------------------------------------------------
def decoder_kernel(x_ref,
                   w1_ref, b1_ref,        # decoder_lin[0]  (E -> Fp)
                   w2_ref, b2_ref,        # decoder_lin[2]  (Fp -> 128)
                   m1_ref, bv1_ref,       # ConvT(32,16,3,s2,p0)   (128 -> 256)
                   m2_ref, bv2_ref,       # ConvT(16,8,3,s2,p1)    (256 -> 256)
                   m3w_ref, bvout_ref,    # ConvT(8,1,3,s2,p0) fused w/ Linear(121,121)
                   o_ref):
    f32 = jnp.float32
    h = jnp.dot(x_ref[...], w1_ref[...], preferred_element_type=f32) + b1_ref[...]
    h = jnp.maximum(h, 0.0)
    h = jnp.dot(h, w2_ref[...], preferred_element_type=f32) + b2_ref[...]
    h = jnp.maximum(h, 0.0)
    # unflatten to (B,32,1,1) is a no-op on the flattened representation
    h = jnp.dot(h, m1_ref[...], preferred_element_type=f32) + bv1_ref[...]
    h = jnp.maximum(h, 0.0)
    h = jnp.dot(h, m2_ref[...], preferred_element_type=f32) + bv2_ref[...]
    h = jnp.maximum(h, 0.0)
    # last ConvTranspose (no ReLU) fused with bias-free output Linear at init
    o_ref[...] = jnp.dot(h, m3w_ref[...], preferred_element_type=f32) + bvout_ref[...]


# ----------------------------------------------------------------------------
# Parameter construction (deterministic, PyTorch-default-style uniform init)
# ----------------------------------------------------------------------------
def init_decoder_params(key, encoded_space_dim, fc2_input_dim):
    def uniform(key, shape, fan_in):
        bound = 1.0 / np.sqrt(fan_in)
        return np.asarray(
            jax.random.uniform(key, shape, jnp.float32, -bound, bound))

    E, F = encoded_space_dim, fc2_input_dim
    ks = jax.random.split(key, 12)

    # decoder_lin: Linear(E, F), Linear(F, 32)   (stored pre-transposed: (in, out))
    w1 = uniform(ks[0], (E, F), E)
    b1 = uniform(ks[1], (1, F), E)
    w2 = uniform(ks[2], (F, 32), F)
    b2 = uniform(ks[3], (1, 32), F)

    # ConvTranspose2d weights (IC, OC, KH, KW); PyTorch fan_in = OC*KH*KW
    wct1 = uniform(ks[4], (32, 16, 3, 3), 16 * 9)
    bct1 = uniform(ks[5], (16,), 16 * 9)
    wct2 = uniform(ks[6], (16, 8, 3, 3), 8 * 9)
    bct2 = uniform(ks[7], (8,), 8 * 9)
    wct3 = uniform(ks[8], (8, 1, 3, 3), 1 * 9)
    bct3 = uniform(ks[9], (1,), 1 * 9)

    # Dense equivalents for the fixed spatial sizes 1->3->5->11.
    m1, (oc1, oh1, ow1) = convtranspose2d_as_matrix(wct1, 1, 1, stride=2, padding=0)
    m2, (oc2, oh2, ow2) = convtranspose2d_as_matrix(wct2, oh1, ow1, stride=2, padding=1)
    m3, (oc3, oh3, ow3) = convtranspose2d_as_matrix(wct3, oh2, ow2, stride=2, padding=0)
    assert (oc1, oh1, ow1) == (16, 3, 3)
    assert (oc2, oh2, ow2) == (8, 5, 5)
    assert (oc3, oh3, ow3) == (1, 11, 11)
    bv1 = np.repeat(bct1, oh1 * ow1)[None, :]                       # (1, 144)
    bv2 = np.repeat(bct2, oh2 * ow2)[None, :]                       # (1, 200)
    bv3 = np.repeat(bct3, oh3 * ow3)[None, :]                       # (1, 121)

    # linear_output: Linear(121, 121, bias=False); stored pre-transposed (in, out)
    wout = uniform(ks[10], (121, 121), 121)

    # Algebraic fusion of the last two linear maps (no ReLU between them).
    m3w = m3 @ wout                                                 # (200, 121)
    bvout = bv3 @ wout                                              # (1, 121)

    # --- lane-dense zero padding (exact: zero cols -> ReLU(0)=0 -> zero rows) ---
    Fp = _round_up(F, 128)      # fc2_input_dim padded
    C1 = 128                    # 32   -> 128
    C2 = 256                    # 144  -> 256
    C3 = 256                    # 200  -> 256
    CO = 128                    # 121  -> 128

    p = {
        # padded operands for the kernel
        "w1": jnp.asarray(_pad2d(w1, E, Fp)),
        "b1": jnp.asarray(_pad2d(b1, 1, Fp)),
        "w2": jnp.asarray(_pad2d(w2, Fp, C1)),
        "b2": jnp.asarray(_pad2d(b2, 1, C1)),
        "m1": jnp.asarray(_pad2d(m1, C1, C2)),
        "bv1": jnp.asarray(_pad2d(bv1, 1, C2)),
        "m2": jnp.asarray(_pad2d(m2, C2, C3)),
        "bv2": jnp.asarray(_pad2d(bv2, 1, C3)),
        "m3w": jnp.asarray(_pad2d(m3w, C3, CO)),
        "bvout": jnp.asarray(_pad2d(bvout, 1, CO)),
        # unpadded / raw copies for the pure-JAX references
        "ref": {
            "w1": jnp.asarray(w1), "b1": jnp.asarray(b1),
            "w2": jnp.asarray(w2), "b2": jnp.asarray(b2),
            "m1": jnp.asarray(m1), "bv1": jnp.asarray(bv1),
            "m2": jnp.asarray(m2), "bv2": jnp.asarray(bv2),
            "m3": jnp.asarray(m3), "bv3": jnp.asarray(bv3),
            "wout": jnp.asarray(wout),
            "wct1": jnp.asarray(wct1), "bct1": jnp.asarray(bct1),
            "wct2": jnp.asarray(wct2), "bct2": jnp.asarray(bct2),
            "wct3": jnp.asarray(wct3), "bct3": jnp.asarray(bct3),
        },
        "dims": {"E": E, "F": F, "Fp": Fp, "CO": CO},
    }
    return p


# ----------------------------------------------------------------------------
# Wrapper
# ----------------------------------------------------------------------------
def decoder_forward(x, params, tile_b=1024):
    B, E = x.shape
    d = params["dims"]
    CO = d["CO"]

    # Batch tile: multiple of 8 (sublane), capped at tile_b; pad B to a multiple.
    # Weights are ~0.6 MB and x/out tiles are small, so a large batch tile
    # amortizes the ~0.35 us per-grid-step overhead while staying far under
    # the VMEM budget even with double buffering.
    tb = min(_round_up(tile_b, 8), _round_up(B, 8))
    b_pad = _round_up(B, tb)
    if b_pad != B:
        x = jnp.pad(x, ((0, b_pad - B), (0, 0)))
    grid = (b_pad // tb,)

    weights = (params["w1"], params["b1"], params["w2"], params["b2"],
               params["m1"], params["bv1"], params["m2"], params["bv2"],
               params["m3w"], params["bvout"])

    def const_spec(a):
        # Same block index every grid step -> weights DMA'd once, stay VMEM-resident.
        return pl.BlockSpec(a.shape, lambda i: (0, 0))

    in_specs = [pl.BlockSpec((tb, E), lambda i: (i, 0))] + [const_spec(w) for w in weights]
    out_spec = pl.BlockSpec((tb, CO), lambda i: (i, 0))

    F = d["F"]
    flops = 2 * B * (E * F + F * 32 + 32 * 144 + 144 * 200 + 200 * 121)
    bytes_accessed = int(sum(int(np.prod(w.shape)) * 4 for w in weights)
                         + B * (E + 121) * 4)
    cost = pl.CostEstimate(flops=flops, transcendentals=0,
                           bytes_accessed=bytes_accessed)

    out_padded = pl.pallas_call(
        decoder_kernel,
        grid=grid,
        in_specs=in_specs,
        out_specs=out_spec,
        out_shape=jax.ShapeDtypeStruct((b_pad, CO), jnp.float32),
        compiler_params=pltpu.CompilerParams(
            dimension_semantics=("parallel",),
            vmem_limit_bytes=64 << 20),
        cost_estimate=cost,
    )(x, *weights)

    # drop batch/lane padding, then reshape to NCHW (B, 1, 11, 11)
    return out_padded[:B, :121].reshape(B, 1, 11, 11)


# ----------------------------------------------------------------------------
# References
# ----------------------------------------------------------------------------
def decoder_forward_ref(x, params):
    # Pure-JAX reference using the unpadded, unfused dense operators.
    p = params["ref"]
    h = jnp.maximum(x @ p["w1"] + p["b1"], 0.0)
    h = jnp.maximum(h @ p["w2"] + p["b2"], 0.0)
    h = jnp.maximum(h @ p["m1"] + p["bv1"], 0.0)
    h = jnp.maximum(h @ p["m2"] + p["bv2"], 0.0)
    h = h @ p["m3"] + p["bv3"]
    h = h @ p["wout"]
    return h.reshape(x.shape[0], 1, 11, 11)


def _conv_transpose_nchw(x, w, b, stride, padding):
    # PyTorch ConvTranspose2d(x, w, stride, padding); w: (IC, OC, KH, KW).
    kh, kw = w.shape[2], w.shape[3]
    w_rot = jnp.transpose(w[:, :, ::-1, ::-1], (1, 0, 2, 3))   # (OC, IC, KH, KW)
    out = lax.conv_general_dilated(
        x, w_rot,
        window_strides=(1, 1),
        padding=[(kh - 1 - padding,) * 2, (kw - 1 - padding,) * 2],
        lhs_dilation=(stride, stride),
        dimension_numbers=("NCHW", "OIHW", "NCHW"))
    return out + b.reshape(1, -1, 1, 1)


def decoder_forward_conv_ref(x, params):
    # Op-for-op mirror of the PyTorch module (validates the conv->matrix glue).
    p = params["ref"]
    B = x.shape[0]
    h = jnp.maximum(x @ p["w1"] + p["b1"], 0.0)
    h = jnp.maximum(h @ p["w2"] + p["b2"], 0.0)
    h = h.reshape(B, 32, 1, 1)
    h = jnp.maximum(_conv_transpose_nchw(h, p["wct1"], p["bct1"], 2, 0), 0.0)
    h = jnp.maximum(_conv_transpose_nchw(h, p["wct2"], p["bct2"], 2, 1), 0.0)
    h = _conv_transpose_nchw(h, p["wct3"], p["bct3"], 2, 0)
    h = h.reshape(B, 121) @ p["wout"]
    return h.reshape(B, 1, 11, 11)


if __name__ == "__main__":
    encoded_space_dim = 8
    fc2_input_dim = 32
    batch = 4

    key = jax.random.PRNGKey(0)
    k_params, k_x = jax.random.split(key)
    params = init_decoder_params(k_params, encoded_space_dim, fc2_input_dim)
    x = jax.random.normal(k_x, (batch, encoded_space_dim), dtype=jnp.float32)

    out = jax.block_until_ready(decoder_forward(x, params))
    ref_dense = jax.block_until_ready(decoder_forward_ref(x, params))
    ref_conv = jax.block_until_ready(decoder_forward_conv_ref(x, params))

    assert out.shape == (batch, 1, 11, 11), out.shape
    np.testing.assert_allclose(np.asarray(out), np.asarray(ref_dense),
                               rtol=1e-4, atol=1e-4)
    np.testing.assert_allclose(np.asarray(out), np.asarray(ref_conv),
                               rtol=1e-4, atol=1e-4)

    print("KERNEL_OK")
</pallas_src>

<mosaic_0001>
module attributes {stable_mosaic.version = 11 : i64} {
  func.func @decoder_kernel(%arg0: i32, %arg1: memref<8x8xf32, #tpu.memory_space<vmem>>, %arg2: memref<8x128xf32, #tpu.memory_space<vmem>>, %arg3: memref<1x128xf32, #tpu.memory_space<vmem>>, %arg4: memref<128x128xf32, #tpu.memory_space<vmem>>, %arg5: memref<1x128xf32, #tpu.memory_space<vmem>>, %arg6: memref<128x256xf32, #tpu.memory_space<vmem>>, %arg7: memref<1x256xf32, #tpu.memory_space<vmem>>, %arg8: memref<256x256xf32, #tpu.memory_space<vmem>>, %arg9: memref<1x256xf32, #tpu.memory_space<vmem>>, %arg10: memref<256x128xf32, #tpu.memory_space<vmem>>, %arg11: memref<1x128xf32, #tpu.memory_space<vmem>>, %arg12: memref<8x128xf32, #tpu.memory_space<vmem>>) attributes {dimension_semantics = [#tpu.dimension_semantics<parallel>], iteration_bounds = array<i64: 1>, scalar_prefetch = 0 : i64, scratch_operands = 0 : i64, tpu.core_type = #tpu.core_type<tc>, window_params = [{transform_indices = @transform_0, window_bounds = array<i64: 8, 8>}, {pipeline_mode = #tpu.pipeline_mode<synchronous>, transform_indices = @transform_1, window_bounds = array<i64: 8, 128>}, {pipeline_mode = #tpu.pipeline_mode<synchronous>, transform_indices = @transform_2, window_bounds = array<i64: 1, 128>}, {pipeline_mode = #tpu.pipeline_mode<synchronous>, transform_indices = @transform_3, window_bounds = array<i64: 128, 128>}, {pipeline_mode = #tpu.pipeline_mode<synchronous>, transform_indices = @transform_4, window_bounds = array<i64: 1, 128>}, {pipeline_mode = #tpu.pipeline_mode<synchronous>, transform_indices = @transform_5, window_bounds = array<i64: 128, 256>}, {pipeline_mode = #tpu.pipeline_mode<synchronous>, transform_indices = @transform_6, window_bounds = array<i64: 1, 256>}, {pipeline_mode = #tpu.pipeline_mode<synchronous>, transform_indices = @transform_7, window_bounds = array<i64: 256, 256>}, {pipeline_mode = #tpu.pipeline_mode<synchronous>, transform_indices = @transform_8, window_bounds = array<i64: 1, 256>}, {pipeline_mode = #tpu.pipeline_mode<synchronous>, transform_indices = @transform_9, window_bounds = array<i64: 256, 128>}, {pipeline_mode = #tpu.pipeline_mode<synchronous>, transform_indices = @transform_10, window_bounds = array<i64: 1, 128>}, {transform_indices = @transform_11, window_bounds = array<i64: 8, 128>}]} {
    %c0 = arith.constant 0 : index
    %c0_0 = arith.constant 0 : index
    %0 = vector.load %arg1[%c0, %c0_0] : memref<8x8xf32, #tpu.memory_space<vmem>>, vector<8x8xf32>
    %c0_1 = arith.constant 0 : index
    %c0_2 = arith.constant 0 : index
    %1 = vector.load %arg2[%c0_1, %c0_2] : memref<8x128xf32, #tpu.memory_space<vmem>>, vector<8x128xf32>
    %cst = arith.constant dense<0.000000e+00> : vector<8x128xf32>
    %2 = tpu.matmul %0, %1, %cst {dimension_numbers = #tpu.dot_dimension_numbers<[1], [0], [0], [1], [0, 0, 1, 1], [], []>} : vector<8x8xf32>, vector<8x128xf32>, vector<8x128xf32> -> vector<8x128xf32>
    %c0_3 = arith.constant 0 : index
    %c0_4 = arith.constant 0 : index
    %3 = vector.load %arg3[%c0_3, %c0_4] : memref<1x128xf32, #tpu.memory_space<vmem>>, vector<1x128xf32>
    %4 = vector.broadcast %3 : vector<1x128xf32> to vector<8x128xf32>
    %5 = arith.addf %2, %4 : vector<8x128xf32>
    %cst_5 = arith.constant 0.000000e+00 : f32
    %6 = vector.broadcast %cst_5 : f32 to vector<8x128xf32>
    %7 = arith.maximumf %5, %6 : vector<8x128xf32>
    %c0_6 = arith.constant 0 : index
    %c0_7 = arith.constant 0 : index
    %8 = vector.load %arg4[%c0_6, %c0_7] : memref<128x128xf32, #tpu.memory_space<vmem>>, vector<128x128xf32>
    %cst_8 = arith.constant dense<0.000000e+00> : vector<8x128xf32>
    %9 = tpu.matmul %7, %8, %cst_8 {dimension_numbers = #tpu.dot_dimension_numbers<[1], [0], [0], [1], [0, 0, 1, 1], [], []>} : vector<8x128xf32>, vector<128x128xf32>, vector<8x128xf32> -> vector<8x128xf32>
    %c0_9 = arith.constant 0 : index
    %c0_10 = arith.constant 0 : index
    %10 = vector.load %arg5[%c0_9, %c0_10] : memref<1x128xf32, #tpu.memory_space<vmem>>, vector<1x128xf32>
    %11 = vector.broadcast %10 : vector<1x128xf32> to vector<8x128xf32>
    %12 = arith.addf %9, %11 : vector<8x128xf32>
    %cst_11 = arith.constant 0.000000e+00 : f32
    %13 = vector.broadcast %cst_11 : f32 to vector<8x128xf32>
    %14 = arith.maximumf %12, %13 : vector<8x128xf32>
    %c0_12 = arith.constant 0 : index
    %c0_13 = arith.constant 0 : index
    %15 = vector.load %arg6[%c0_12, %c0_13] : memref<128x256xf32, #tpu.memory_space<vmem>>, vector<128x256xf32>
    %cst_14 = arith.constant dense<0.000000e+00> : vector<8x256xf32>
    %16 = tpu.matmul %14, %15, %cst_14 {dimension_numbers = #tpu.dot_dimension_numbers<[1], [0], [0], [1], [0, 0, 1, 1], [], []>} : vector<8x128xf32>, vector<128x256xf32>, vector<8x256xf32> -> vector<8x256xf32>
    %c0_15 = arith.constant 0 : index
    %c0_16 = arith.constant 0 : index
    %17 = vector.load %arg7[%c0_15, %c0_16] : memref<1x256xf32, #tpu.memory_space<vmem>>, vector<1x256xf32>
    %18 = vector.broadcast %17 : vector<1x256xf32> to vector<8x256xf32>
    %19 = arith.addf %16, %18 : vector<8x256xf32>
    %cst_17 = arith.constant 0.000000e+00 : f32
    %20 = vector.broadcast %cst_17 : f32 to vector<8x256xf32>
    %21 = arith.maximumf %19, %20 : vector<8x256xf32>
    %c0_18 = arith.constant 0 : index
    %c0_19 = arith.constant 0 : index
    %22 = vector.load %arg8[%c0_18, %c0_19] : memref<256x256xf32, #tpu.memory_space<vmem>>, vector<256x256xf32>
    %cst_20 = arith.constant dense<0.000000e+00> : vector<8x256xf32>
    %23 = tpu.matmul %21, %22, %cst_20 {dimension_numbers = #tpu.dot_dimension_numbers<[1], [0], [0], [1], [0, 0, 1, 1], [], []>} : vector<8x256xf32>, vector<256x256xf32>, vector<8x256xf32> -> vector<8x256xf32>
    %c0_21 = arith.constant 0 : index
    %c0_22 = arith.constant 0 : index
    %24 = vector.load %arg9[%c0_21, %c0_22] : memref<1x256xf32, #tpu.memory_space<vmem>>, vector<1x256xf32>
    %25 = vector.broadcast %24 : vector<1x256xf32> to vector<8x256xf32>
    %26 = arith.addf %23, %25 : vector<8x256xf32>
    %cst_23 = arith.constant 0.000000e+00 : f32
    %27 = vector.broadcast %cst_23 : f32 to vector<8x256xf32>
    %28 = arith.maximumf %26, %27 : vector<8x256xf32>
    %c0_24 = arith.constant 0 : index
    %c0_25 = arith.constant 0 : index
    %29 = vector.load %arg10[%c0_24, %c0_25] : memref<256x128xf32, #tpu.memory_space<vmem>>, vector<256x128xf32>
    %cst_26 = arith.constant dense<0.000000e+00> : vector<8x128xf32>
    %30 = tpu.matmul %28, %29, %cst_26 {dimension_numbers = #tpu.dot_dimension_numbers<[1], [0], [0], [1], [0, 0, 1, 1], [], []>} : vector<8x256xf32>, vector<256x128xf32>, vector<8x128xf32> -> vector<8x128xf32>
    %c0_27 = arith.constant 0 : index
    %c0_28 = arith.constant 0 : index
    %31 = vector.load %arg11[%c0_27, %c0_28] : memref<1x128xf32, #tpu.memory_space<vmem>>, vector<1x128xf32>
    %32 = vector.broadcast %31 : vector<1x128xf32> to vector<8x128xf32>
    %33 = arith.addf %30, %32 : vector<8x128xf32>
    %c0_29 = arith.constant 0 : index
    %c0_30 = arith.constant 0 : index
    %34 = vector.load %arg12[%c0_29, %c0_30] : memref<8x128xf32, #tpu.memory_space<vmem>>, vector<8x128xf32>
    tpu.vector_store %arg12[%c0_29, %c0_30], %33 {strides = array<i32>} : memref<8x128xf32, #tpu.memory_space<vmem>>, vector<8x128xf32>,
    return
  }
  func.func @transform_0(%arg0: i32) -> (i32, i32) {
    %c0_i32 = arith.constant 0 : i32
    %c0_i32_0 = arith.constant 0 : i32
    return %arg0, %c0_i32 : i32, i32
  }
  func.func @transform_1(%arg0: i32) -> (i32, i32) {
    %c0_i32 = arith.constant 0 : i32
    %c0_i32_0 = arith.constant 0 : i32
    %c0_i32_1 = arith.constant 0 : i32
    return %c0_i32, %c0_i32_0 : i32, i32
  }
  func.func @transform_2(%arg0: i32) -> (i32, i32) {
    %c0_i32 = arith.constant 0 : i32
    %c0_i32_0 = arith.constant 0 : i32
    %c0_i32_1 = arith.constant 0 : i32
    return %c0_i32, %c0_i32_0 : i32, i32
  }
  func.func @transform_3(%arg0: i32) -> (i32, i32) {
    %c0_i32 = arith.constant 0 : i32
    %c0_i32_0 = arith.constant 0 : i32
    %c0_i32_1 = arith.constant 0 : i32
    return %c0_i32, %c0_i32_0 : i32, i32
  }
  func.func @transform_4(%arg0: i32) -> (i32, i32) {
    %c0_i32 = arith.constant 0 : i32
    %c0_i32_0 = arith.constant 0 : i32
    %c0_i32_1 = arith.constant 0 : i32
    return %c0_i32, %c0_i32_0 : i32, i32
  }
  func.func @transform_5(%arg0: i32) -> (i32, i32) {
    %c0_i32 = arith.constant 0 : i32
    %c0_i32_0 = arith.constant 0 : i32
    %c0_i32_1 = arith.constant 0 : i32
    return %c0_i32, %c0_i32_0 : i32, i32
  }
  func.func @transform_6(%arg0: i32) -> (i32, i32) {
    %c0_i32 = arith.constant 0 : i32
    %c0_i32_0 = arith.constant 0 : i32
    %c0_i32_1 = arith.constant 0 : i32
    return %c0_i32, %c0_i32_0 : i32, i32
  }
  func.func @transform_7(%arg0: i32) -> (i32, i32) {
    %c0_i32 = arith.constant 0 : i32
    %c0_i32_0 = arith.constant 0 : i32
    %c0_i32_1 = arith.constant 0 : i32
    return %c0_i32, %c0_i32_0 : i32, i32
  }
  func.func @transform_8(%arg0: i32) -> (i32, i32) {
    %c0_i32 = arith.constant 0 : i32
    %c0_i32_0 = arith.constant 0 : i32
    %c0_i32_1 = arith.constant 0 : i32
    return %c0_i32, %c0_i32_0 : i32, i32
  }
  func.func @transform_9(%arg0: i32) -> (i32, i32) {
    %c0_i32 = arith.constant 0 : i32
    %c0_i32_0 = arith.constant 0 : i32
    %c0_i32_1 = arith.constant 0 : i32
    return %c0_i32, %c0_i32_0 : i32, i32
  }
  func.func @transform_10(%arg0: i32) -> (i32, i32) {
    %c0_i32 = arith.constant 0 : i32
    %c0_i32_0 = arith.constant 0 : i32
    %c0_i32_1 = arith.constant 0 : i32
    return %c0_i32, %c0_i32_0 : i32, i32
  }
  func.func @transform_11(%arg0: i32) -> (i32, i32) {
    %c0_i32 = arith.constant 0 : i32
    %c0_i32_0 = arith.constant 0 : i32
    return %arg0, %c0_i32 : i32, i32
  }
}

</mosaic_0001>

<bundles_post_ra>
// kernel: tpu_custom_call.1
= control target key start
LH: loop header
LB: loop body
LE: loop exit
PB: predicated region body
PF: predicated region fallthrough
CT: control target
= control target key end

     0   :  { %16 = vsyncpa [#allocation3], 0  ;;  %s924_s0 = inlined_call_operand.hbm [shape: f32[8,8], index: 0, kind: input, shape index: {}]   ;;  %s925_s1 = inlined_call_operand.hbm [shape: f32[8,128], index: 1, kind: input, shape index: {}]   ;;  %s926_s2 = inlined_call_operand.hbm [shape: f32[1,128], index: 2, kind: input, shape index: {}]   ;;  %s927_s3 = inlined_call_operand.hbm [shape: f32[128,128], index: 3, kind: input, shape index: {}]   ;;  %s928_s4 = inlined_call_operand.hbm [shape: f32[1,128], index: 4, kind: input, shape index: {}]   ;;  %s929_s5 = inlined_call_operand.hbm [shape: f32[128,256], index: 5, kind: input, shape index: {}]   ;;  %s930_s6 = inlined_call_operand.vmem [shape: f32[1,256], index: 6, kind: input, shape index: {}]   ;;  %s931_s7 = inlined_call_operand.hbm [shape: f32[256,256], index: 7, kind: input, shape index: {}]   ;;  %s932_s8 = inlined_call_operand.vmem [shape: f32[1,256], index: 8, kind: input, shape index: {}]   ;;  %s933_s9 = inlined_call_operand.hbm [shape: f32[256,128], index: 9, kind: input, shape index: {}]   ;;  %s934_s10 = inlined_call_operand.vmem [shape: f32[1,128], index: 10, kind: input, shape index: {}]   ;;  %s935_s11 = inlined_call_operand.hbm [shape: f32[8,128], index: 11, kind: output, shape index: {}]  }
   0x1   :  { %17 = vsyncpa [#allocation6], 0 }
   0x2   :  { %18 = vsyncpa [#allocation9], 0 }
   0x3   :  { %19 = vsyncpa [#allocation12], 0 }
   0x4   :  { %20 = vsyncpa [#allocation15], 0  ;;  %s38_s19 = sshll.u32 %s925_s1, 4  ;;  %s39_s19 = int_to_ptr.hbm [resolvable:$true] %s38_s19 }
   0x5   :  { %21 = vsyncpa [#allocation4], 0  ;;  %s803_s20 = smov [#allocation5]   ;;  %s59_s24 = sshll.u32 %s927_s3, 4  ;;  %s60_s24 = int_to_ptr.hbm [resolvable:$true] %s59_s24 }
   0x6   :  { %s40_s21 = sshll.u32 %s803_s20, 4  ;;  %s804_s25 = smov [#allocation8]   ;;  %s41_s21 = int_to_ptr.vmem [resolvable:$true] %s40_s21 }
   0x7   :  { %43 = dma.hbm_to_vmem [thread:$0]  %s39_s19, 128, %s41_s21, [#allocation6]  }
   0x8   :  { %s61_s26 = sshll.u32 %s804_s25, 4  ;;  %s805_s27 = smov 128   ;;  %s62_s26 = int_to_ptr.vmem [resolvable:$true] %s61_s26 }
   0x9   :  { %s806_s28 = smov 8   ;;  %s83_s30 = sshll.u32 %s929_s5, 4  ;;  %s84_s30 = int_to_ptr.hbm [resolvable:$true] %s83_s30 }
   0xa   :  { %67 = dma.hbm_to_vmem [thread:$0]  %s60_s24, 2048, %s62_s26, [#allocation9], %s805_s27, %s805_s27, %s806_s28  }
   0xb   :  { %s807_s12 = smov [#allocation11]   ;;  %s27_s15 = sshll.u32 %s924_s0, 4  ;;  %s28_s15 = int_to_ptr.hbm [resolvable:$true] %s27_s15 }
   0xc   :  { %s85_s13 = sshll.u32 %s807_s12, 4  ;;  %s808_s16 = smov 256   ;;  %s86_s13 = int_to_ptr.vmem [resolvable:$true] %s85_s13 }
   0xd   :  { %s809_s17 = smov 16   ;;  %s810_s18 = smov [#allocation2]  }
   0xe   :  { %91 = dma.hbm_to_vmem [thread:$0]  %s84_s30, 4096, %s86_s13, [#allocation12], %s808_s16, %s808_s16, %s809_s17  }
   0xf   :  { %s29_s19 = sshll.u32 %s810_s18, 4  ;;  %s49_s5 = sshll.u32 %s926_s2, 4  ;;  %s30_s19 = int_to_ptr.vmem [resolvable:$true] %s29_s19  ;;  %s50_s5 = int_to_ptr.hbm [resolvable:$true] %s49_s5 }
  0x10   :  { %32 = dma.hbm_to_vmem [thread:$0]  %s28_s15, 128, %s30_s19, [#allocation3]  }
  0x11   :  { %s73_s0 = sshll.u32 %s928_s4, 4  ;;  %s811_s24 = smov [#allocation7]   ;;  %s74_s0 = int_to_ptr.hbm [resolvable:$true] %s73_s0 }
  0x12   :  { %s51_s25 = sshll.u32 %s811_s24, 4  ;;  %s812_s26 = smov [#allocation10]   ;;  %s52_s25 = int_to_ptr.vmem [resolvable:$true] %s51_s25 }
  0x13   :  { %54 = dma.hbm_to_vmem [thread:$0]  %s50_s5, 16, %s52_s25, [#allocation6]  }
  0x14   :  { %s75_s1 = sshll.u32 %s812_s26, 4  ;;  %s98_s12 = sshll.u32 %s931_s7, 4  ;;  %s76_s1 = int_to_ptr.vmem [resolvable:$true] %s75_s1  ;;  %s99_s12 = int_to_ptr.hbm [resolvable:$true] %s98_s12 }
  0x15   :  { %78 = dma.hbm_to_vmem [thread:$0]  %s74_s0, 16, %s76_s1, [#allocation9]  }
  0x16   :  { %s113_s3 = sshll.u32 %s933_s9, 4  ;;  %s813_s14 = smov [#allocation13]   ;;  %s114_s3 = int_to_ptr.hbm [resolvable:$true] %s113_s3 }
  0x17   :  { %s100_s4 = sshll.u32 %s813_s14, 4  ;;  %s814_s15 = smov [#allocation14]   ;;  %s101_s4 = int_to_ptr.vmem [resolvable:$true] %s100_s4 }
  0x18   :  { %106 = dma.hbm_to_vmem [thread:$0]  %s99_s12, 8192, %s101_s4, [#allocation12], %s808_s16, %s808_s16, %s809_s17  }
  0x19   :  { %s115_s18 = sshll.u32 %s814_s15, 4  ;;  %s116_s18 = int_to_ptr.vmem [resolvable:$true] %s115_s18 }
  0x1a   :  { %121 = dma.hbm_to_vmem [thread:$0]  %s114_s3, 4096, %s116_s18, [#allocation15], %s805_s27, %s805_s27, %s806_s28  }
  0x1b   :  { %791 = dma.done.wait [#allocation3], 128  }
  0x1c   :  { %792 = vsyncadd [#allocation3], 4294967168 }
  0x1d   :  { %793 = dma.done.wait [#allocation6], 144  }
  0x1e   :  { %794 = vsyncadd [#allocation6], 4294967152 }
  0x1f   :  { %795 = dma.done.wait [#allocation9], 2064  }
  0x20   :  { %796 = vsyncadd [#allocation9], 4294965232 }
  0x21   :  { %797 = dma.done.wait [#allocation12], 12288  }
  0x22   :  { %798 = vsyncadd [#allocation12], 4294955008 }
  0x23   :  { %799 = dma.done.wait [#allocation15], 4096  }
  0x24   :  { %800 = vsyncadd [#allocation15], 4294963200  ;;  %vm162_vm0 = vcmask 64512   ;;  %v157_v0 = vld [vmem:[#allocation5] sm:$0xff]  ;;  %v156_v1 = vld [vmem:[#allocation2] sm:$0xff]  ;;  %s544_s21 = sshll.u32 %s935_s11, 4  ;;  %s545_s21 = int_to_ptr.hbm [resolvable:$true] %s544_s21 }
  0x25   :  { %v202_v2 = vld [vmem:[#allocation8 + $0x78] sm:$0xff]  ;;  %181 = vmatpush.msra.mxu0 %v157_v0  ;;  %v201_v3 = vld [vmem:[#allocation8 + $0x70] sm:$0xff]  ;;  %v200_v4 = vld [vmem:[#allocation8 + $0x68] sm:$0xff] }
  0x26   :  { %207 = vmatpush.msra.mxu1 %v202_v2  ;;  %558 = vmatmul.msk.f32.vlgmr.msra.gmra.mxu0 %vm162_vm0, %v156_v1  ;;  %v199_v5 = vld [vmem:[#allocation8 + $0x60] sm:$0xff]  ;;  %v198_v6 = vld [vmem:[#allocation8 + $0x58] sm:$0xff]  ;;  %v197_v7 = vld [vmem:[#allocation8 + $0x50] sm:$0xff] }
  0x27   :  { %v196_v8 = vld [vmem:[#allocation8 + $0x48] sm:$0xff]  ;;  %v195_v9 = vld [vmem:[#allocation8 + $0x40] sm:$0xff]  ;;  %v194_v10 = vld [vmem:[#allocation8 + $0x38] sm:$0xff] }
  0x28   :  { %208 = vmatpush.msra.mxu1 %v201_v3  ;;  %v193_v11 = vld [vmem:[#allocation8 + $0x30] sm:$0xff]  ;;  %v192_v12 = vld [vmem:[#allocation8 + $0x28] sm:$0xff]  ;;  %v191_v13 = vld [vmem:[#allocation8 + $0x20] sm:$0xff] }
  0x29   :  { %v190_v14 = vld [vmem:[#allocation8 + $0x18] sm:$0xff]  ;;  %v189_v15 = vld [vmem:[#allocation8 + $0x10] sm:$0xff]  ;;  %v188_v16 = vld [vmem:[#allocation8 + $0x8] sm:$0xff] }
  0x2a   :  { %209 = vmatpush.msra.mxu1 %v200_v4  ;;  %v187_v17 = vld [vmem:[#allocation8] sm:$0xff]  ;;  %v258_v18 = vld [vmem:[#allocation11 + $0xf0] sm:$0xff]  ;;  %v257_v21 = vld [vmem:[#allocation11 + $0xe8] sm:$0xff] }
  0x2b   :  { %v259_v19 = vld [vmem:[#allocation11 + $0xf8] sm:$0xff]  ;;  %v256_v20 = vld [vmem:[#allocation11 + $0xe0] sm:$0xff]  ;;  %266 = vmatpush.msra.mxu2 %v258_v18  ;;  %v254_v22 = vld [vmem:[#allocation11 + $0xd0] sm:$0xff] }
  0x2c   :  { %210 = vmatpush.msra.mxu1 %v199_v5  ;;  %286 = vmatpush.msra.mxu3 %v259_v19  ;;  %v255_v23 = vld [vmem:[#allocation11 + $0xd8] sm:$0xff]  ;;  %v252_v24 = vld [vmem:[#allocation11 + $0xc0] sm:$0xff]  ;;  %v253_v25 = vld [vmem:[#allocation11 + $0xc8] sm:$0xff] }
  0x2d   :  { %267 = vmatpush.msra.mxu2 %v256_v20  ;;  %v250_v26 = vld [vmem:[#allocation11 + $0xb0] sm:$0xff]  ;;  %v251_v27 = vld [vmem:[#allocation11 + $0xb8] sm:$0xff]  ;;  %v248_v28 = vld [vmem:[#allocation11 + $0xa0] sm:$0xff] }
  0x2e   :  { %211 = vmatpush.msra.mxu1 %v198_v6  ;;  %287 = vmatpush.msra.mxu3 %v257_v21  ;;  %v249_v29 = vld [vmem:[#allocation11 + $0xa8] sm:$0xff]  ;;  %v246_v30 = vld [vmem:[#allocation11 + $0x90] sm:$0xff]  ;;  %v247_v31 = vld [vmem:[#allocation11 + $0x98] sm:$0xff] }
  0x2f   :  { %268 = vmatpush.msra.mxu2 %v254_v22  ;;  %v244_v32 = vld [vmem:[#allocation11 + $0x80] sm:$0xff]  ;;  %v245_v33 = vld [vmem:[#allocation11 + $0x88] sm:$0xff]  ;;  %v242_v34 = vld [vmem:[#allocation11 + $0x70] sm:$0xff] }
  0x30   :  { %212 = vmatpush.msra.mxu1 %v197_v7  ;;  %288 = vmatpush.msra.mxu3 %v255_v23  ;;  %v243_v35 = vld [vmem:[#allocation11 + $0x78] sm:$0xff]  ;;  %v240_v36 = vld [vmem:[#allocation11 + $0x60] sm:$0xff]  ;;  %v241_v37 = vld [vmem:[#allocation11 + $0x68] sm:$0xff] }
  0x31   :  { %269 = vmatpush.msra.mxu2 %v252_v24  ;;  %v238_v38 = vld [vmem:[#allocation11 + $0x50] sm:$0xff]  ;;  %v239_v39 = vld [vmem:[#allocation11 + $0x58] sm:$0xff]  ;;  %v236_v40 = vld [vmem:[#allocation11 + $0x40] sm:$0xff] }
  0x32   :  { %213 = vmatpush.msra.mxu1 %v196_v8  ;;  %289 = vmatpush.msra.mxu3 %v253_v25  ;;  %v237_v41 = vld [vmem:[#allocation11 + $0x48] sm:$0xff]  ;;  %v234_v42 = vld [vmem:[#allocation11 + $0x30] sm:$0xff]  ;;  %v235_v43 = vld [vmem:[#allocation11 + $0x38] sm:$0xff] }
  0x33   :  { %270 = vmatpush.msra.mxu2 %v250_v26  ;;  %v572_v44 = vld [vmem:[#allocation7] ss:$0 sm:$0xff]  ;;  %v232_v48 = vld [vmem:[#allocation11 + $0x20] sm:$0xff]  ;;  %v233_v49 = vld [vmem:[#allocation11 + $0x28] sm:$0xff] }
  0x34   :  { %214 = vmatpush.msra.mxu1 %v195_v9  ;;  %290 = vmatpush.msra.mxu3 %v251_v27  ;;  %v230_v50 = vld [vmem:[#allocation11 + $0x10] sm:$0xff]  ;;  %v231_v51 = vld [vmem:[#allocation11 + $0x18] sm:$0xff]  ;;  %v228_v52 = vld [vmem:[#allocation11] sm:$0xff] }
  0x35   :  { %271 = vmatpush.msra.mxu2 %v248_v28  ;;  %v229_v53 = vld [vmem:[#allocation11 + $0x8] sm:$0xff]  ;;  %v338_v54 = vld [vmem:[#allocation13 + $0xf0] sm:$0xff]  ;;  %v339_v56 = vld [vmem:[#allocation13 + $0xf8] sm:$0xff] }
  0x36   :  { %215 = vmatpush.msra.mxu1 %v194_v10  ;;  %291 = vmatpush.msra.mxu3 %v249_v29  ;;  %v370_v55 = vld [vmem:[#allocation13 + $0x1f0] sm:$0xff]  ;;  %v371_v57 = vld [vmem:[#allocation13 + $0x1f8] sm:$0xff]  ;;  %v336_v58 = vld [vmem:[#allocation13 + $0xe0] sm:$0xff] }
  0x37   :  { %272 = vmatpush.msra.mxu2 %v246_v30  ;;  %378 = vmatpush.msrb.mxu0 %v338_v54  ;;  %v368_v59 = vld [vmem:[#allocation13 + $0x1e0] sm:$0xff]  ;;  %v337_v60 = vld [vmem:[#allocation13 + $0xe8] sm:$0xff]  ;;  %v334_v62 = vld [vmem:[#allocation13 + $0xd0] sm:$0xff] }
  0x38   :  { %216 = vmatpush.msra.mxu1 %v193_v11  ;;  %292 = vmatpush.msra.mxu3 %v247_v31  ;;  %v369_v61 = vld [vmem:[#allocation13 + $0x1e8] sm:$0xff]  ;;  %v366_v63 = vld [vmem:[#allocation13 + $0x1d0] sm:$0xff]  ;;  %v335_v0 = vld [vmem:[#allocation13 + $0xd8] sm:$0xff] }
  0x39   :  { %273 = vmatpush.msra.mxu2 %v244_v32  ;;  %379 = vmatpush.msrb.mxu0 %v336_v58  ;;  %v367_v1 = vld [vmem:[#allocation13 + $0x1d8] sm:$0xff]  ;;  %v332_v2 = vld [vmem:[#allocation13 + $0xc0] sm:$0xff]  ;;  %v333_v4 = vld [vmem:[#allocation13 + $0xc8] sm:$0xff] }
  0x3a   :  { %217 = vmatpush.msra.mxu1 %v192_v12  ;;  %293 = vmatpush.msra.mxu3 %v245_v33  ;;  %v364_v3 = vld [vmem:[#allocation13 + $0x1c0] sm:$0xff]  ;;  %v365_v5 = vld [vmem:[#allocation13 + $0x1c8] sm:$0xff]  ;;  %v330_v6 = vld [vmem:[#allocation13 + $0xb0] sm:$0xff] }
  0x3b   :  { %274 = vmatpush.msra.mxu2 %v242_v34  ;;  %380 = vmatpush.msrb.mxu0 %v334_v62  ;;  %v362_v7 = vld [vmem:[#allocation13 + $0x1b0] sm:$0xff]  ;;  %v331_v8 = vld [vmem:[#allocation13 + $0xb8] sm:$0xff]  ;;  %v328_v10 = vld [vmem:[#allocation13 + $0xa0] sm:$0xff] }
  0x3c   :  { %218 = vmatpush.msra.mxu1 %v191_v13  ;;  %294 = vmatpush.msra.mxu3 %v243_v35  ;;  %v363_v9 = vld [vmem:[#allocation13 + $0x1b8] sm:$0xff]  ;;  %v360_v11 = vld [vmem:[#allocation13 + $0x1a0] sm:$0xff]  ;;  %v329_v12 = vld [vmem:[#allocation13 + $0xa8] sm:$0xff] }
  0x3d   :  { %275 = vmatpush.msra.mxu2 %v240_v36  ;;  %381 = vmatpush.msrb.mxu0 %v332_v2  ;;  %v361_v13 = vld [vmem:[#allocation13 + $0x1a8] sm:$0xff]  ;;  %v324_v18 = vld [vmem:[#allocation13 + $0x80] sm:$0xff]  ;;  %v322_v22 = vld [vmem:[#allocation13 + $0x70] sm:$0xff] }
  0x3e   :  { %219 = vmatpush.msra.mxu1 %v190_v14  ;;  %295 = vmatpush.msra.mxu3 %v241_v37  ;;  %v326_v14 = vld [vmem:[#allocation13 + $0x90] sm:$0xff]  ;;  %v356_v19 = vld [vmem:[#allocation13 + $0x180] sm:$0xff]  ;;  %v325_v20 = vld [vmem:[#allocation13 + $0x88] sm:$0xff] }
  0x3f   :  { %276 = vmatpush.msra.mxu2 %v238_v38  ;;  %382 = vmatpush.msrb.mxu0 %v330_v6  ;;  %v357_v21 = vld [vmem:[#allocation13 + $0x188] sm:$0xff]  ;;  %v354_v23 = vld [vmem:[#allocation13 + $0x170] sm:$0xff]  ;;  %v323_v24 = vld [vmem:[#allocation13 + $0x78] sm:$0xff] }
  0x40   :  { %220 = vmatpush.msra.mxu1 %v189_v15  ;;  %296 = vmatpush.msra.mxu3 %v239_v39  ;;  %v358_v15 = vld [vmem:[#allocation13 + $0x190] sm:$0xff]  ;;  %v355_v25 = vld [vmem:[#allocation13 + $0x178] sm:$0xff]  ;;  %v320_v26 = vld [vmem:[#allocation13 + $0x60] sm:$0xff] }
  0x41   :  { %277 = vmatpush.msra.mxu2 %v236_v40  ;;  %383 = vmatpush.msrb.mxu0 %v328_v10  ;;  %v352_v27 = vld [vmem:[#allocation13 + $0x160] sm:$0xff]  ;;  %v321_v28 = vld [vmem:[#allocation13 + $0x68] sm:$0xff]  ;;  %v318_v30 = vld [vmem:[#allocation13 + $0x50] sm:$0xff] }
  0x42   :  { %221 = vmatpush.msra.mxu1 %v188_v16  ;;  %297 = vmatpush.msra.mxu3 %v237_v41  ;;  %v327_v16 = vld [vmem:[#allocation13 + $0x98] sm:$0xff]  ;;  %v353_v29 = vld [vmem:[#allocation13 + $0x168] sm:$0xff]  ;;  %v350_v31 = vld [vmem:[#allocation13 + $0x150] sm:$0xff] }
  0x43   :  { %278 = vmatpush.msra.mxu2 %v234_v42  ;;  %384 = vmatpush.msrb.mxu0 %v326_v14  ;;  %v319_v32 = vld [vmem:[#allocation13 + $0x58] sm:$0xff]  ;;  %v316_v34 = vld [vmem:[#allocation13 + $0x40] sm:$0xff]  ;;  %v317_v36 = vld [vmem:[#allocation13 + $0x48] sm:$0xff] }
  0x44   :  { %222 = vmatpush.msra.mxu1 %v187_v17  ;;  %298 = vmatpush.msra.mxu3 %v235_v43  ;;  %v359_v17 = vld [vmem:[#allocation13 + $0x198] sm:$0xff]  ;;  %v348_v35 = vld [vmem:[#allocation13 + $0x140] sm:$0xff]  ;;  %v349_v37 = vld [vmem:[#allocation13 + $0x148] sm:$0xff] }
  0x45   :  { %279 = vmatpush.msra.mxu2 %v232_v48  ;;  %385 = vmatpush.msrb.mxu0 %v324_v18  ;;  %v351_v33 = vld [vmem:[#allocation13 + $0x158] sm:$0xff]  ;;  %v314_v38 = vld [vmem:[#allocation13 + $0x30] sm:$0xff]  ;;  %v313_v48 = vld [vmem:[#allocation13 + $0x28] sm:$0xff] }
  0x46   :  { %299 = vmatpush.msra.mxu3 %v233_v49  ;;  %398 = vmatpush.msrb.mxu1 %v370_v55  ;;  %v346_v39 = vld [vmem:[#allocation13 + $0x130] sm:$0xff]  ;;  %v315_v40 = vld [vmem:[#allocation13 + $0x38] sm:$0xff]  ;;  %v345_v49 = vld [vmem:[#allocation13 + $0x128] sm:$0xff] }
  0x47   :  { %280 = vmatpush.msra.mxu2 %v230_v50  ;;  %386 = vmatpush.msrb.mxu0 %v322_v22  ;;  %v347_v41 = vld [vmem:[#allocation13 + $0x138] sm:$0xff]  ;;  %v310_v50 = vld [vmem:[#allocation13 + $0x10] sm:$0xff]  ;;  %v308_v54 = vld [vmem:[#allocation13] sm:$0xff] }
  0x48   :  { %300 = vmatpush.msra.mxu3 %v231_v51  ;;  %399 = vmatpush.msrb.mxu1 %v368_v59  ;;  %v573_v42 = vld [vmem:[#allocation10] ss:$0 sm:$0xff]  ;;  %v342_v51 = vld [vmem:[#allocation13 + $0x110] sm:$0xff]  ;;  %v340_v55 = vld [vmem:[#allocation13 + $0x100] sm:$0xff] }
  0x49   :  { %281 = vmatpush.msra.mxu2 %v228_v52  ;;  %387 = vmatpush.msrb.mxu0 %v320_v26  ;;  %v311_v52 = vld [vmem:[#allocation13 + $0x18] sm:$0xff]  ;;  %v474_v59 = vld [vmem:[#allocation14 + $0x70] sm:$0xff]  ;;  %v469_v6 = vld [vmem:[#allocation14 + $0x48] sm:$0xff] }
  0x4a   :  { %301 = vmatpush.msra.mxu3 %v229_v53  ;;  %400 = vmatpush.msrb.mxu1 %v366_v63  ;;  %v343_v53 = vld [vmem:[#allocation13 + $0x118] sm:$0xff]  ;;  %v490_v62 = vld [vmem:[#allocation14 + $0xf0] sm:$0xff]  ;;  %v489_v63 = vld [vmem:[#allocation14 + $0xe8] sm:$0xff] }
  0x4b   :  { %418 = vmatpush.msrb.mxu2 %v339_v56  ;;  %388 = vmatpush.msrb.mxu0 %v318_v30  ;;  %v309_v56 = vld [vmem:[#allocation13 + $0x8] sm:$0xff]  ;;  %v475_v58 = vld [vmem:[#allocation14 + $0x78] sm:$0xff]  ;;  %v462_v26 = vld [vmem:[#allocation14 + $0x10] sm:$0xff] }
  0x4c   :  { %438 = vmatpush.msrb.mxu3 %v371_v57  ;;  %401 = vmatpush.msrb.mxu1 %v364_v3  ;;  %v341_v57 = vld [vmem:[#allocation13 + $0x108] sm:$0xff]  ;;  %v471_v2 = vld [vmem:[#allocation14 + $0x58] sm:$0xff]  ;;  %v460_v30 = vld [vmem:[#allocation14] sm:$0xff] }
  0x4d   :  { %419 = vmatpush.msrb.mxu2 %v337_v60  ;;  %389 = vmatpush.msrb.mxu0 %v316_v34  ;;  %v491_v60 = vld [vmem:[#allocation14 + $0xf8] sm:$0xff]  ;;  %v260_v14 = vld [vmem:[%s930_s6] sm:$0x3]  ;;  %v476_v34 = vld [vmem:[#allocation14 + $0x80] sm:$0xff] }
  0x4e   :  { %439 = vmatpush.msrb.mxu3 %v369_v61  ;;  %402 = vmatpush.msrb.mxu1 %v362_v7  ;;  %v473_v61 = vld [vmem:[#allocation14 + $0x68] sm:$0xff]  ;;  %v487_v3 = vld [vmem:[#allocation14 + $0xd8] sm:$0xff] }
  0x4f   :  { %420 = vmatpush.msrb.mxu2 %v335_v0  ;;  %390 = vmatpush.msrb.mxu0 %v314_v38  ;;  %v472_v0 = vld [vmem:[#allocation14 + $0x60] sm:$0xff]  ;;  %v485_v7 = vld [vmem:[#allocation14 + $0xc8] sm:$0xff]  ;;  %v467_v10 = vld [vmem:[#allocation14 + $0x38] sm:$0xff] }
  0x50   :  { %440 = vmatpush.msrb.mxu3 %v367_v1  ;;  %403 = vmatpush.msrb.mxu1 %v360_v11  ;;  %v488_v1 = vld [vmem:[#allocation14 + $0xe0] sm:$0xff]  ;;  %v483_v11 = vld [vmem:[#allocation14 + $0xb8] sm:$0xff] }
  0x51   :  { %421 = vmatpush.msrb.mxu2 %v333_v4  ;;  %v470_v4 = vld [vmem:[#allocation14 + $0x50] sm:$0xff] }
  0x52   :  { %441 = vmatpush.msrb.mxu3 %v365_v5  ;;  %404 = vmatpush.msrb.mxu1 %v358_v15  ;;  %v486_v5 = vld [vmem:[#allocation14 + $0xd0] sm:$0xff]  ;;  %v464_v15 = vld [vmem:[#allocation14 + $0x20] sm:$0xff] }
  0x53   :  { %422 = vmatpush.msrb.mxu2 %v331_v8  ;;  %v468_v8 = vld [vmem:[#allocation14 + $0x40] sm:$0xff] }
  0x54   :  { %442 = vmatpush.msrb.mxu3 %v363_v9  ;;  %405 = vmatpush.msrb.mxu1 %v356_v19  ;;  %v484_v9 = vld [vmem:[#allocation14 + $0xc0] sm:$0xff] }
  0x55   :  { %423 = vmatpush.msrb.mxu2 %v329_v12  ;;  %v466_v12 = vld [vmem:[#allocation14 + $0x30] sm:$0xff] }
  0x56   :  { %443 = vmatpush.msrb.mxu3 %v361_v13  ;;  %406 = vmatpush.msrb.mxu1 %v354_v23  ;;  %v465_v13 = vld [vmem:[#allocation14 + $0x28] sm:$0xff] }
  0x57   :  { %424 = vmatpush.msrb.mxu2 %v327_v16  ;;  %v262_v16 = vperm.slane %v260_v14, 0 }
  0x58   :  { %444 = vmatpush.msrb.mxu3 %v359_v17  ;;  %407 = vmatpush.msrb.mxu1 %v352_v27  ;;  %v263_v17 = vperm.slane %v260_v14, 1  ;;  %v481_v27 = vld [vmem:[#allocation14 + $0xa8] sm:$0xff] }
  0x59   :  { %425 = vmatpush.msrb.mxu2 %v325_v20 }
  0x5a   :  { %445 = vmatpush.msrb.mxu3 %v357_v21  ;;  %408 = vmatpush.msrb.mxu1 %v350_v31  ;;  %v479_v31 = vld [vmem:[#allocation14 + $0x98] sm:$0xff] }
  0x5b   :  { %426 = vmatpush.msrb.mxu2 %v323_v24  ;;  %v463_v24 = vld [vmem:[#allocation14 + $0x18] sm:$0xff] }
  0x5c   :  { %446 = vmatpush.msrb.mxu3 %v355_v25  ;;  %409 = vmatpush.msrb.mxu1 %v348_v35  ;;  %v482_v25 = vld [vmem:[#allocation14 + $0xb0] sm:$0xff]  ;;  %v372_v35 = vld [vmem:[%s932_s8] sm:$0x3]  ;;  %s815_s8 = smov [#allocation16]  }
  0x5d   :  { %427 = vmatpush.msrb.mxu2 %v321_v28  ;;  %v461_v28 = vld [vmem:[#allocation14 + $0x8] sm:$0xff]  ;;  %s542_s17 = sshll.u32 %s815_s8, 4  ;;  %s543_s17 = int_to_ptr.vmem [resolvable:$true] %s542_s17 }
  0x5e   :  { %447 = vmatpush.msrb.mxu3 %v353_v29  ;;  %410 = vmatpush.msrb.mxu1 %v346_v39  ;;  %v480_v29 = vld [vmem:[#allocation14 + $0xa0] sm:$0xff] }
  0x5f   :  { %428 = vmatpush.msrb.mxu2 %v319_v32  ;;  %v478_v32 = vld [vmem:[#allocation14 + $0x90] sm:$0xff] }
  0x60   :  { %448 = vmatpush.msrb.mxu3 %v351_v33  ;;  %v477_v33 = vld [vmem:[#allocation14 + $0x88] sm:$0xff] }
  0x61   :  { %429 = vmatpush.msrb.mxu2 %v317_v36  ;;  %v374_v36 = vperm.slane %v372_v35, 0 }
  0x62   :  { %449 = vmatpush.msrb.mxu3 %v349_v37 }
  0x63   :  { %430 = vmatpush.msrb.mxu2 %v315_v40 }
  0x64   :  { %450 = vmatpush.msrb.mxu3 %v347_v41  ;;  %v375_v41 = vperm.slane %v372_v35, 1 }
  0x65   :  { %431 = vmatpush.msrb.mxu2 %v313_v48  ;;  %v574_v48 = vld [vmem:[%s934_s10] ss:$0 sm:$0xff] }
  0x66   :  { %451 = vmatpush.msrb.mxu3 %v345_v49 }
  0x67   :  { %432 = vmatpush.msrb.mxu2 %v311_v52 }
  0x68   :  { %452 = vmatpush.msrb.mxu3 %v343_v53 }
  0x69   :  { %433 = vmatpush.msrb.mxu2 %v309_v56 }
  0x6a   :  { %453 = vmatpush.msrb.mxu3 %v341_v57 }
  0xa3   :  { %v183_v45 = vpop.f32.mrf.mxu0 }
  0xa4   :  { %v184_v46 = vadd.f32 %v572_v44, %v183_v45 }
  0xa6   :  { %v186_v47 = vmax.f32 %v184_v46, 0.0  ;;  %v312_v46 = vld [vmem:[#allocation13 + $0x20] sm:$0xff] }
  0xa7   :  { %391 = vmatpush.msrb.mxu0 %v312_v46 }
  0xa8   :  { %223 = vmatmul.f32.vlgmr.msra.gmra.mxu1 %v186_v47  ;;  %v344_v47 = vld [vmem:[#allocation13 + $0x120] sm:$0xff] }
  0xa9   :  { %411 = vmatpush.msrb.mxu1 %v344_v47  ;;  %392 = vmatpush.msrb.mxu0 %v310_v50 }
  0xab   :  { %412 = vmatpush.msrb.mxu1 %v342_v51  ;;  %393 = vmatpush.msrb.mxu0 %v308_v54 }
  0xad   :  { %413 = vmatpush.msrb.mxu1 %v340_v55  ;;  %496 = vmatpush.msra.mxu0 %v475_v58 }
  0xaf   :  { %516 = vmatpush.msra.mxu1 %v491_v60  ;;  %497 = vmatpush.msra.mxu0 %v474_v59 }
  0xb1   :  { %517 = vmatpush.msra.mxu1 %v490_v62  ;;  %498 = vmatpush.msra.mxu0 %v473_v61 }
  0xb3   :  { %518 = vmatpush.msra.mxu1 %v489_v63  ;;  %499 = vmatpush.msra.mxu0 %v472_v0 }
  0xb5   :  { %519 = vmatpush.msra.mxu1 %v488_v1  ;;  %500 = vmatpush.msra.mxu0 %v471_v2 }
  0xb7   :  { %520 = vmatpush.msra.mxu1 %v487_v3  ;;  %501 = vmatpush.msra.mxu0 %v470_v4 }
  0xb9   :  { %521 = vmatpush.msra.mxu1 %v486_v5  ;;  %502 = vmatpush.msra.mxu0 %v469_v6 }
  0xbb   :  { %522 = vmatpush.msra.mxu1 %v485_v7  ;;  %503 = vmatpush.msra.mxu0 %v468_v8 }
  0xbd   :  { %523 = vmatpush.msra.mxu1 %v484_v9  ;;  %504 = vmatpush.msra.mxu0 %v467_v10 }
  0xbf   :  { %524 = vmatpush.msra.mxu1 %v483_v11  ;;  %505 = vmatpush.msra.mxu0 %v466_v12 }
  0xc1   :  { %506 = vmatpush.msra.mxu0 %v465_v13  ;;  %525 = vmatpush.msra.mxu1 %v482_v25 }
  0xc3   :  { %507 = vmatpush.msra.mxu0 %v464_v15  ;;  %526 = vmatpush.msra.mxu1 %v481_v27 }
  0xc5   :  { %508 = vmatpush.msra.mxu0 %v463_v24  ;;  %527 = vmatpush.msra.mxu1 %v480_v29 }
  0xc7   :  { %509 = vmatpush.msra.mxu0 %v462_v26  ;;  %528 = vmatpush.msra.mxu1 %v479_v31 }
  0xc9   :  { %510 = vmatpush.msra.mxu0 %v461_v28  ;;  %529 = vmatpush.msra.mxu1 %v478_v32 }
  0xcb   :  { %511 = vmatpush.msra.mxu0 %v460_v30  ;;  %530 = vmatpush.msra.mxu1 %v477_v33 }
  0xcd   :  { %531 = vmatpush.msra.mxu1 %v476_v34 }
 0x125   :  { %v224_v43 = vpop.f32.mrf.mxu1 }
 0x126   :  { %v225_v44 = vadd.f32 %v573_v42, %v224_v43 }
 0x128   :  { %v227_v45 = vmax.f32 %v225_v44, 0.0 }
 0x12a   :  { %282 = vmatmul.f32.vlgmr.msra.gmra.mxu2 %v227_v45  ;;  %302 = vmatmul.f32.vlgmr.msra.gmra.mxu3 %v227_v45 }
 0x1ad   :  { %v283_v18 = vpop.f32.mrf.mxu2  ;;  %v303_v19 = vpop.f32.mrf.mxu3 }
 0x1ae   :  { %v284_v20 = vadd.f32 %v283_v18, %v262_v16  ;;  %v304_v21 = vadd.f32 %v303_v19, %v263_v17 }
 0x1b0   :  { %v306_v22 = vmax.f32 %v284_v20, 0.0  ;;  %v307_v23 = vmax.f32 %v304_v21, 0.0 }
 0x1b2   :  { %394 = vmatmul.f32.vlgmr.msrb.gmra.mxu0 %v306_v22  ;;  %414 = vmatmul.f32.vlgmr.msrb.gmra.mxu1 %v307_v23 }
 0x1b3   :  { %434 = vmatmul.f32.vlgmr.msrb.gmra.mxu2 %v306_v22  ;;  %454 = vmatmul.f32.vlgmr.msrb.gmra.mxu3 %v307_v23 }
 0x22f   :  { %v395_v37 = vpop.f32.mrf.mxu0  ;;  %v415_v39 = vpop.f32.mrf.mxu1 }
 0x230   :  { %v396_v38 = vadd.f32 %v395_v37, %v374_v36 }
 0x232   :  { %v416_v40 = vadd.f32 %v415_v39, %v396_v38 }
 0x234   :  { %v458_v42 = vmax.f32 %v416_v40, 0.0 }
 0x236   :  { %v435_v43 = vpop.f32.mrf.mxu2  ;;  %512 = vmatmul.f32.vlgmr.msra.gmra.mxu0 %v458_v42  ;;  %v455_v45 = vpop.f32.mrf.mxu3 }
 0x237   :  { %v436_v44 = vadd.f32 %v435_v43, %v375_v41 }
 0x239   :  { %v456_v46 = vadd.f32 %v455_v45, %v436_v44 }
 0x23b   :  { %v459_v47 = vmax.f32 %v456_v46, 0.0 }
 0x23d   :  { %532 = vmatmul.f32.vlgmr.msra.gmra.mxu1 %v459_v47 }
 0x2b3   :  { %v513_v49 = vpop.f32.mrf.mxu0 }
 0x2b4   :  { %v514_v50 = vadd.f32 %v574_v48, %v513_v49 }
 0x2ba   :  { %v533_v51 = vpop.f32.mrf.mxu1 }
 0x2bb   :  { %v534_v52 = vadd.f32 %v533_v51, %v514_v50 }
 0x2bd   :  { %536 = vst [vmem:[#allocation16] sm:$0xff] %v534_v52 }
 0x2be   :  { %547 = dma.vmem_to_hbm [thread:$0]  %s543_s17, 128, %s545_s21, [#allocation4]  }
 0x2bf   :  { %801 = dma.done.wait [#allocation4], 128  }
 0x2c0   :  { %802 = vsyncadd [#allocation4], 4294967168 }
 0x2c1   :  { %552 = vsyncpa [#allocation3], 1 }
 0x2c2   :  { %553 = vsyncpa [#allocation6], 1 }
 0x2c3   :  { %554 = vsyncpa [#allocation9], 1 }
 0x2c4   :  { %555 = vsyncpa [#allocation12], 1 }
 0x2c5   :  { %556 = vsyncpa [#allocation15], 1 }
 0x2c6   :  { %557 = vsyncpa [#allocation4], 1 }

</bundles_post_ra>
